<compile_context>
chip_gen: v5e
topology: v5e:2x2
jax: 0.10.0
libtpu: 0.0.40
codegen_flags: <defaults>
</compile_context>

<pallas_src>
import functools

import jax
import jax.numpy as jnp
import numpy as np
from jax.experimental import pallas as pl
from jax.experimental.pallas import tpu as pltpu


def _round_up(a, m):
    return (a + m - 1) // m * m


def critic_kernel(x_ref, w1_ref, b1_ref, w2_ref, b2_ref, w3_ref, b3_ref, o_ref):
    # x_ref:  (block_b, num_inputs)      (f32 or bf16)
    # w1_ref: (Hp, num_inputs)           torch fc1.weight, hidden zero-padded
    # b1_ref: (1, Hp)                    f32
    # w2_ref: (Hp, Hp)                   torch fc2.weight, zero-padded
    # b2_ref: (Hp, 1)                    f32
    # w3_ref: (Hp, 1)                    torch fc3.weight^T, zero-padded, f32
    # b3_ref: (1, 1) in SMEM             f32 scalar
    # o_ref:  (1, block_b)               lane-dense output row
    x = x_ref[...]

    # fc1: x @ W1^T  (contract last dims of both operands -> MXU).
    h1 = jax.lax.dot_general(
        x, w1_ref[...], (((1,), (1,)), ((), ())),
        preferred_element_type=jnp.float32)
    h1 = jnp.maximum(h1 + b1_ref[...], 0.0)                      # (block_b, Hp) f32

    # fc2, transposed orientation: W2 @ h1^T == (h1 @ W2^T)^T.
    h2t = jax.lax.dot_general(
        w2_ref[...], h1.astype(w2_ref.dtype), (((1,), (1,)), ((), ())),
        preferred_element_type=jnp.float32)
    h2t = jnp.maximum(h2t + b2_ref[...], 0.0)                    # (Hp, block_b) f32

    # fc3 (out_features == 1): VPU multiply + sublane reduction (XLU),
    # directly yielding the lane-dense (1, block_b) output row.
    v = jnp.sum(h2t * w3_ref[...], axis=0, keepdims=True) + b3_ref[0, 0]
    o_ref[...] = v.astype(o_ref.dtype)


@functools.partial(jax.jit, static_argnames=("block_b", "use_bf16"))
def critic_forward(x, params, block_b=512, use_bf16=False):
    w1, b1, w2, b2, w3, b3 = params  # PyTorch layouts
    B, num_inputs = x.shape
    H = w1.shape[0]
    Hp = _round_up(H, 128)

    # Pick a batch tile: multiple of 128, no larger than the (padded) batch,
    # and small enough that batches > 128 give >= 2 grid steps (v7x: 2 TCs).
    bb = min(int(block_b), _round_up(B, 128))
    if B > 128:
        bb = min(bb, _round_up((B + 1) // 2, 128))
    bb = max(128, _round_up(bb, 128))
    Bp = _round_up(B, bb)
    grid = (Bp // bb,)

    # Zero-pad hidden dim to full lane width (numerically an identity).
    w1p = jnp.pad(w1, ((0, Hp - H), (0, 0)))
    b1p = jnp.pad(b1, ((0, Hp - H),)).reshape(1, Hp).astype(jnp.float32)
    w2p = jnp.pad(w2, ((0, Hp - H), (0, Hp - H)))
    b2p = jnp.pad(b2, ((0, Hp - H),)).reshape(Hp, 1).astype(jnp.float32)
    w3p = jnp.pad(w3, ((0, 0), (0, Hp - H))).reshape(Hp, 1).astype(jnp.float32)
    b3p = b3.reshape(1, 1).astype(jnp.float32)

    # Zero-pad batch to a tile multiple (padded rows are sliced off below).
    xp = jnp.pad(x, ((0, Bp - B), (0, 0)))

    if use_bf16:  # bf16 MXU operands (v6e/v7x); accumulation stays f32.
        xp = xp.astype(jnp.bfloat16)
        w1p = w1p.astype(jnp.bfloat16)
        w2p = w2p.astype(jnp.bfloat16)

    out = pl.pallas_call(
        critic_kernel,
        out_shape=jax.ShapeDtypeStruct((Bp // bb, bb), jnp.float32),
        grid=grid,
        in_specs=[
            pl.BlockSpec((bb, num_inputs), lambda i: (i, 0)),   # x batch tile
            pl.BlockSpec((Hp, num_inputs), lambda i: (0, 0)),   # w1 (whole)
            pl.BlockSpec((1, Hp), lambda i: (0, 0)),            # b1 row
            pl.BlockSpec((Hp, Hp), lambda i: (0, 0)),           # w2 (whole)
            pl.BlockSpec((Hp, 1), lambda i: (0, 0)),            # b2 column
            pl.BlockSpec((Hp, 1), lambda i: (0, 0)),            # w3 column
            pl.BlockSpec(memory_space=pltpu.MemorySpace.SMEM),  # b3 scalar
        ],
        out_specs=pl.BlockSpec((1, bb), lambda i: (i, 0)),      # lane-dense row
        compiler_params=pltpu.CompilerParams(
            dimension_semantics=("parallel",)),
    )(xp, w1p, b1p, w2p, b2p, w3p, b3p)

    return out.reshape(Bp)[:B].reshape(B, 1)


def init_critic_params(key, num_inputs, num_hidden):
    """Matches the PyTorch module init (xavier_uniform weights, bias = 0.01)."""
    def xavier(k, fan_out, fan_in, gain):
        bound = gain * np.sqrt(6.0 / (fan_in + fan_out))
        return jax.random.uniform(k, (fan_out, fan_in), jnp.float32, -bound, bound)

    k1, k2, k3 = jax.random.split(key, 3)
    g = float(np.sqrt(2.0))
    w1 = xavier(k1, num_hidden, num_inputs, g)
    b1 = jnp.full((num_hidden,), 0.01, jnp.float32)
    w2 = xavier(k2, num_hidden, num_hidden, g)
    b2 = jnp.full((num_hidden,), 0.01, jnp.float32)
    w3 = xavier(k3, 1, num_hidden, 1.0)
    b3 = jnp.full((1,), 0.01, jnp.float32)
    return (w1, b1, w2, b2, w3, b3)


def critic_reference(x, params):
    w1, b1, w2, b2, w3, b3 = params
    h1 = jnp.maximum(x @ w1.T + b1, 0.0)
    h2 = jnp.maximum(h1 @ w2.T + b2, 0.0)
    return h2 @ w3.T + b3


if __name__ == "__main__":
    num_inputs, num_hidden = 32, 64
    key = jax.random.PRNGKey(0)
    kx1, kx2, kp = jax.random.split(key, 3)
    params = init_critic_params(kp, num_inputs, num_hidden)

    # 1) Small batch, f32, single grid step.
    x1 = jax.random.normal(kx1, (8, num_inputs), jnp.float32)
    v1 = critic_forward(x1, params)
    jax.block_until_ready(v1)
    assert v1.shape == (8, 1)
    np.testing.assert_allclose(np.asarray(v1), np.asarray(critic_reference(x1, params)),
                               rtol=1e-5, atol=1e-5)

    # 2) Non-aligned batch, f32, multi-step grid (exercises padding + tiling).
    x2 = jax.random.normal(kx2, (300, num_inputs), jnp.float32)
    v2 = critic_forward(x2, params, block_b=128)
    jax.block_until_ready(v2)
    assert v2.shape == (300, 1)
    np.testing.assert_allclose(np.asarray(v2), np.asarray(critic_reference(x2, params)),
                               rtol=1e-5, atol=1e-5)

    # 3) bf16 MXU operands (v6e/v7x fast path), looser tolerance.
    v3 = critic_forward(x2, params, use_bf16=True)
    jax.block_until_ready(v3)
    np.testing.assert_allclose(np.asarray(v3), np.asarray(critic_reference(x2, params)),
                               rtol=5e-2, atol=5e-2)

    print("KERNEL_OK")
</pallas_src>

<mosaic_0001>
module attributes {stable_mosaic.version = 11 : i64} {
  func.func @critic_kernel(%arg0: i32, %arg1: memref<128x32xf32, #tpu.memory_space<vmem>>, %arg2: memref<128x32xf32, #tpu.memory_space<vmem>>, %arg3: memref<1x128xf32, #tpu.memory_space<vmem>>, %arg4: memref<128x128xf32, #tpu.memory_space<vmem>>, %arg5: memref<128x1xf32, #tpu.memory_space<vmem>>, %arg6: memref<128x1xf32, #tpu.memory_space<vmem>>, %arg7: memref<1x1xf32, #tpu.memory_space<smem>>, %arg8: memref<1x128xf32, #tpu.memory_space<vmem>>) attributes {dimension_semantics = [#tpu.dimension_semantics<parallel>], iteration_bounds = array<i64: 1>, scalar_prefetch = 0 : i64, scratch_operands = 0 : i64, tpu.core_type = #tpu.core_type<tc>, window_params = [{transform_indices = @transform_0, window_bounds = array<i64: 128, 32>}, {pipeline_mode = #tpu.pipeline_mode<synchronous>, transform_indices = @transform_1, window_bounds = array<i64: 128, 32>}, {pipeline_mode = #tpu.pipeline_mode<synchronous>, transform_indices = @transform_2, window_bounds = array<i64: 1, 128>}, {pipeline_mode = #tpu.pipeline_mode<synchronous>, transform_indices = @transform_3, window_bounds = array<i64: 128, 128>}, {pipeline_mode = #tpu.pipeline_mode<synchronous>, transform_indices = @transform_4, window_bounds = array<i64: 128, 1>}, {pipeline_mode = #tpu.pipeline_mode<synchronous>, transform_indices = @transform_5, window_bounds = array<i64: 128, 1>}, {transform_indices = @transform_6, window_bounds = array<i64: 1, 1>}, {transform_indices = @transform_7, window_bounds = array<i64: 1, 128>}]} {
    %c0 = arith.constant 0 : index
    %c0_0 = arith.constant 0 : index
    %0 = vector.load %arg1[%c0, %c0_0] : memref<128x32xf32, #tpu.memory_space<vmem>>, vector<128x32xf32>
    %c0_1 = arith.constant 0 : index
    %c0_2 = arith.constant 0 : index
    %1 = vector.load %arg2[%c0_1, %c0_2] : memref<128x32xf32, #tpu.memory_space<vmem>>, vector<128x32xf32>
    %cst = arith.constant dense<0.000000e+00> : vector<128x128xf32>
    %2 = tpu.matmul %0, %1, %cst {dimension_numbers = #tpu.dot_dimension_numbers<[1], [1], [0], [0], [0, 0, 1, 0], [], []>} : vector<128x32xf32>, vector<128x32xf32>, vector<128x128xf32> -> vector<128x128xf32>
    %c0_3 = arith.constant 0 : index
    %c0_4 = arith.constant 0 : index
    %3 = vector.load %arg3[%c0_3, %c0_4] : memref<1x128xf32, #tpu.memory_space<vmem>>, vector<1x128xf32>
    %4 = vector.broadcast %3 : vector<1x128xf32> to vector<128x128xf32>
    %5 = arith.addf %2, %4 : vector<128x128xf32>
    %cst_5 = arith.constant 0.000000e+00 : f32
    %6 = vector.broadcast %cst_5 : f32 to vector<128x128xf32>
    %7 = arith.maximumf %5, %6 : vector<128x128xf32>
    %c0_6 = arith.constant 0 : index
    %c0_7 = arith.constant 0 : index
    %8 = vector.load %arg4[%c0_6, %c0_7] : memref<128x128xf32, #tpu.memory_space<vmem>>, vector<128x128xf32>
    %cst_8 = arith.constant dense<0.000000e+00> : vector<128x128xf32>
    %9 = tpu.matmul %8, %7, %cst_8 {dimension_numbers = #tpu.dot_dimension_numbers<[1], [1], [0], [0], [0, 0, 1, 0], [], []>} : vector<128x128xf32>, vector<128x128xf32>, vector<128x128xf32> -> vector<128x128xf32>
    %c0_9 = arith.constant 0 : index
    %c0_10 = arith.constant 0 : index
    %10 = vector.load %arg5[%c0_9, %c0_10] : memref<128x1xf32, #tpu.memory_space<vmem>>, vector<128x1xf32>
    %11 = vector.broadcast %10 : vector<128x1xf32> to vector<128x128xf32>
    %12 = arith.addf %9, %11 : vector<128x128xf32>
    %cst_11 = arith.constant 0.000000e+00 : f32
    %13 = vector.broadcast %cst_11 : f32 to vector<128x128xf32>
    %14 = arith.maximumf %12, %13 : vector<128x128xf32>
    %c0_12 = arith.constant 0 : index
    %c0_13 = arith.constant 0 : index
    %15 = vector.load %arg6[%c0_12, %c0_13] : memref<128x1xf32, #tpu.memory_space<vmem>>, vector<128x1xf32>
    %16 = vector.broadcast %15 : vector<128x1xf32> to vector<128x128xf32>
    %17 = arith.mulf %14, %16 : vector<128x128xf32>
    %cst_14 = arith.constant dense<0.000000e+00> : vector<128xf32>
    %18 = vector.multi_reduction <add>, %17, %cst_14 [0] : vector<128x128xf32> to vector<128xf32>
    %19 = vector.shape_cast %18 : vector<128xf32> to vector<1x128xf32>
    %c0_15 = arith.constant 0 : index
    %c0_16 = arith.constant 0 : index
    %20 = memref.load %arg7[%c0_15, %c0_16] : memref<1x1xf32, #tpu.memory_space<smem>>
    %21 = vector.broadcast %20 : f32 to vector<1x128xf32>
    %22 = arith.addf %19, %21 : vector<1x128xf32>
    %c0_17 = arith.constant 0 : index
    %c0_18 = arith.constant 0 : index
    %23 = vector.load %arg8[%c0_17, %c0_18] : memref<1x128xf32, #tpu.memory_space<vmem>>, vector<1x128xf32>
    tpu.vector_store %arg8[%c0_17, %c0_18], %22 {strides = array<i32>} : memref<1x128xf32, #tpu.memory_space<vmem>>, vector<1x128xf32>,
    return
  }
  func.func @transform_0(%arg0: i32) -> (i32, i32) {
    %c0_i32 = arith.constant 0 : i32
    %c0_i32_0 = arith.constant 0 : i32
    return %arg0, %c0_i32 : i32, i32
  }
  func.func @transform_1(%arg0: i32) -> (i32, i32) {
    %c0_i32 = arith.constant 0 : i32
    %c0_i32_0 = arith.constant 0 : i32
    %c0_i32_1 = arith.constant 0 : i32
    return %c0_i32, %c0_i32_0 : i32, i32
  }
  func.func @transform_2(%arg0: i32) -> (i32, i32) {
    %c0_i32 = arith.constant 0 : i32
    %c0_i32_0 = arith.constant 0 : i32
    %c0_i32_1 = arith.constant 0 : i32
    return %c0_i32, %c0_i32_0 : i32, i32
  }
  func.func @transform_3(%arg0: i32) -> (i32, i32) {
    %c0_i32 = arith.constant 0 : i32
    %c0_i32_0 = arith.constant 0 : i32
    %c0_i32_1 = arith.constant 0 : i32
    return %c0_i32, %c0_i32_0 : i32, i32
  }
  func.func @transform_4(%arg0: i32) -> (i32, i32) {
    %c0_i32 = arith.constant 0 : i32
    %c0_i32_0 = arith.constant 0 : i32
    %c0_i32_1 = arith.constant 0 : i32
    return %c0_i32, %c0_i32_0 : i32, i32
  }
  func.func @transform_5(%arg0: i32) -> (i32, i32) {
    %c0_i32 = arith.constant 0 : i32
    %c0_i32_0 = arith.constant 0 : i32
    %c0_i32_1 = arith.constant 0 : i32
    return %c0_i32, %c0_i32_0 : i32, i32
  }
  func.func @transform_6(%arg0: i32) -> (i32, i32) {
    %c0_i32 = arith.constant 0 : i32
    %c0_i32_0 = arith.constant 0 : i32
    %c0_i32_1 = arith.constant 0 : i32
    return %c0_i32, %c0_i32_0 : i32, i32
  }
  func.func @transform_7(%arg0: i32) -> (i32, i32) {
    %c0_i32 = arith.constant 0 : i32
    %c0_i32_0 = arith.constant 0 : i32
    return %arg0, %c0_i32 : i32, i32
  }
}

</mosaic_0001>

<bundles_post_ra>
// kernel: critic_forward.1
= control target key start
LH: loop header
LB: loop body
LE: loop exit
PB: predicated region body
PF: predicated region fallthrough
CT: control target
= control target key end

     0   :  { %vm63_vm0 = vcmask 261120   ;;  %v644_v35 = vmov 0   ;;  %s1036_s1 = inlined_call_operand.vmem [shape: f32[128,32], index: 1, kind: input, shape index: {}]   ;;  %s1037_s2 = inlined_call_operand.vmem [shape: f32[1,128], index: 2, kind: input, shape index: {}]   ;;  %s1038_s0 = inlined_call_operand.vmem [shape: f32[128,32], index: 0, kind: input, shape index: {}]   ;;  %s1039_s4 = inlined_call_operand.vmem [shape: f32[128,1], index: 4, kind: input, shape index: {}]   ;;  %s1040_s5 = inlined_call_operand.vmem [shape: f32[128,1], index: 5, kind: input, shape index: {}]   ;;  %s1041_s3 = inlined_call_operand.vmem [shape: f32[128,128], index: 3, kind: input, shape index: {}]   ;;  %s1042_s6 = inlined_call_operand.<no memory space> [shape: f32[1,1], index: 6, kind: input, shape index: {}]   ;;  %s1043_s7 = inlined_call_operand.vmem [shape: f32[1,128], index: 7, kind: output, shape index: {}]  }
   0x1   :  { %v58_v0 = vld [vmem:[%s1036_s1 + $0x78] sm:$0xff]  ;;  %v57_v1 = vld [vmem:[%s1036_s1 + $0x70] sm:$0xff]  ;;  %v56_v2 = vld [vmem:[%s1036_s1 + $0x68] sm:$0xff]  ;;  %640 = vset.pattern.permute.xlu0 %v644_v35  ;;  %641 = vset.pattern.permute.xlu1 %v644_v35 }
   0x2   :  { %607 = vmatpush.xpose.msk.msra.mxu2 %vm63_vm0, %v58_v0  ;;  %575 = vmatpush.xpose.msk.msra.mxu0 %vm63_vm0, %v58_v0  ;;  %v55_v3 = vld [vmem:[%s1036_s1 + $0x60] sm:$0xff]  ;;  %v54_v4 = vld [vmem:[%s1036_s1 + $0x58] sm:$0xff]  ;;  %v53_v5 = vld [vmem:[%s1036_s1 + $0x50] sm:$0xff] }
   0x3   :  { %v52_v6 = vld [vmem:[%s1036_s1 + $0x48] sm:$0xff]  ;;  %v51_v7 = vld [vmem:[%s1036_s1 + $0x40] sm:$0xff]  ;;  %v50_v8 = vld [vmem:[%s1036_s1 + $0x38] sm:$0xff]  ;;  %642 = vset.pattern.permute.xlu2 %v644_v35 }
   0x4   :  { %v49_v9 = vld [vmem:[%s1036_s1 + $0x30] sm:$0xff]  ;;  %v48_v10 = vld [vmem:[%s1036_s1 + $0x28] sm:$0xff]  ;;  %v47_v11 = vld [vmem:[%s1036_s1 + $0x20] sm:$0xff] }
   0x5   :  { %v46_v12 = vld [vmem:[%s1036_s1 + $0x18] sm:$0xff]  ;;  %v45_v13 = vld [vmem:[%s1036_s1 + $0x10] sm:$0xff]  ;;  %v44_v14 = vld [vmem:[%s1036_s1 + $0x8] sm:$0xff] }
   0x6   :  { %608 = vmatpush.xpose.msk.msra.mxu2 %vm63_vm0, %v57_v1  ;;  %576 = vmatpush.xpose.msk.msra.mxu0 %vm63_vm0, %v57_v1  ;;  %v43_v15 = vld [vmem:[%s1036_s1] sm:$0xff]  ;;  %v36_v18 = vld [vmem:[%s1038_s0 + $0x48] sm:$0xff]  ;;  %v37_v20 = vld [vmem:[%s1038_s0 + $0x50] sm:$0xff] }
   0x7   :  { %v35_v16 = vld [vmem:[%s1038_s0 + $0x40] sm:$0xff]  ;;  %v28_v19 = vld [vmem:[%s1038_s0 + $0x8] sm:$0xff]  ;;  %v29_v21 = vld [vmem:[%s1038_s0 + $0x10] sm:$0xff] }
   0x8   :  { %v27_v17 = vld [vmem:[%s1038_s0] sm:$0xff]  ;;  %v38_v22 = vld [vmem:[%s1038_s0 + $0x58] sm:$0xff]  ;;  %v40_v26 = vld [vmem:[%s1038_s0 + $0x68] sm:$0xff] }
   0x9   :  { %v30_v23 = vld [vmem:[%s1038_s0 + $0x18] sm:$0xff]  ;;  %v39_v24 = vld [vmem:[%s1038_s0 + $0x60] sm:$0xff]  ;;  %v32_v27 = vld [vmem:[%s1038_s0 + $0x28] sm:$0xff] }
   0xa   :  { %609 = vmatpush.xpose.msk.msra.mxu2 %vm63_vm0, %v56_v2  ;;  %577 = vmatpush.xpose.msk.msra.mxu0 %vm63_vm0, %v56_v2  ;;  %v31_v25 = vld [vmem:[%s1038_s0 + $0x20] sm:$0xff]  ;;  %v41_v28 = vld [vmem:[%s1038_s0 + $0x70] sm:$0xff]  ;;  %v42_v30 = vld [vmem:[%s1038_s0 + $0x78] sm:$0xff] }
   0xb   :  { %v33_v29 = vld [vmem:[%s1038_s0 + $0x30] sm:$0xff]  ;;  %v34_v31 = vld [vmem:[%s1038_s0 + $0x38] sm:$0xff]  ;;  %v257_v37 = vld [vmem:[%s1039_s4] sm:$0xff] }
   0xc   :  { %275 = vperm.xlu0 %640, %v257_v37   ;;  %v259_v38 = vld [vmem:[%s1039_s4 + $0x10] sm:$0xff]  ;;  %v258_v41 = vld [vmem:[%s1039_s4 + $0x8] sm:$0xff]  ;;  %v260_v42 = vld [vmem:[%s1039_s4 + $0x18] sm:$0xff] }
   0xd   :  { %285 = vperm.xlu1 %641, %v259_v38   ;;  %v263_v43 = vld [vmem:[%s1039_s4 + $0x30] sm:$0xff]  ;;  %v264_v46 = vld [vmem:[%s1039_s4 + $0x38] sm:$0xff]  ;;  %v266_v47 = vld [vmem:[%s1039_s4 + $0x48] sm:$0xff] }
   0xe   :  { %610 = vmatpush.xpose.msk.msra.mxu2 %vm63_vm0, %v55_v3  ;;  %578 = vmatpush.xpose.msk.msra.mxu0 %vm63_vm0, %v55_v3  ;;  %v267_v49 = vld [vmem:[%s1039_s4 + $0x50] sm:$0xff]  ;;  %v269_v51 = vld [vmem:[%s1039_s4 + $0x60] sm:$0xff]  ;;  %v270_v53 = vld [vmem:[%s1039_s4 + $0x68] sm:$0xff] }
   0xf   :  { %v261_v55 = vld [vmem:[%s1039_s4 + $0x20] sm:$0xff]  ;;  %v272_v56 = vld [vmem:[%s1039_s4 + $0x78] sm:$0xff]  ;;  %v262_v63 = vld [vmem:[%s1039_s4 + $0x28] sm:$0xff] }
  0x10   :  { %295 = vperm.xlu2 %642, %v261_v55   ;;  %v884_v57 = vld [vmem:[%s1037_s2] ss:$0 sm:$0xff]  ;;  %v436_v3 = vld [vmem:[%s1040_s5 + $0x10] sm:$0xff]  ;;  %v449_v35 = vld [vmem:[%s1040_s5 + $0x78] sm:$0xff] }
  0x11   :  { %v434_v60 = vld [vmem:[%s1040_s5] sm:$0xff]  ;;  %v251_v55 = vld [vmem:[%s1041_s3 + $0x50] sm:$0xff] }
  0x12   :  { %611 = vmatpush.xpose.msk.msra.mxu2 %vm63_vm0, %v54_v4  ;;  %579 = vmatpush.xpose.msk.msra.mxu0 %vm63_vm0, %v54_v4  ;;  %v437_v4 = vld [vmem:[%s1040_s5 + $0x18] sm:$0xff]  ;;  %v438_v38 = vld [vmem:[%s1040_s5 + $0x20] sm:$0xff] }
  0x14   :  { %280 = vperm.xlu0 %640, %v258_v41  }
  0x15   :  { %290 = vperm.xlu1 %641, %v260_v42  }
  0x16   :  { %612 = vmatpush.xpose.msk.msra.mxu2 %vm63_vm0, %v53_v5  ;;  %580 = vmatpush.xpose.msk.msra.mxu0 %vm63_vm0, %v53_v5 }
  0x18   :  { %300 = vperm.xlu2 %642, %v262_v63   ;;  %v255_v63 = vld [vmem:[%s1041_s3 + $0x70] sm:$0xff] }
  0x1a   :  { %613 = vmatpush.xpose.msk.msra.mxu2 %vm63_vm0, %v52_v6  ;;  %581 = vmatpush.xpose.msk.msra.mxu0 %vm63_vm0, %v52_v6 }
  0x1c   :  { %305 = vperm.xlu0 %640, %v263_v43  }
  0x1d   :  { %310 = vperm.xlu1 %641, %v264_v46  }
  0x1e   :  { %614 = vmatpush.xpose.msk.msra.mxu2 %vm63_vm0, %v51_v7  ;;  %582 = vmatpush.xpose.msk.msra.mxu0 %vm63_vm0, %v51_v7  ;;  %v265_v7 = vld [vmem:[%s1039_s4 + $0x40] sm:$0xff] }
  0x20   :  { %315 = vperm.xlu2 %642, %v265_v7  }
  0x22   :  { %615 = vmatpush.xpose.msk.msra.mxu2 %vm63_vm0, %v50_v8  ;;  %583 = vmatpush.xpose.msk.msra.mxu0 %vm63_vm0, %v50_v8 }
  0x24   :  { %320 = vperm.xlu0 %640, %v266_v47  }
  0x25   :  { %325 = vperm.xlu1 %641, %v267_v49  }
  0x26   :  { %616 = vmatpush.xpose.msk.msra.mxu2 %vm63_vm0, %v49_v9  ;;  %584 = vmatpush.xpose.msk.msra.mxu0 %vm63_vm0, %v49_v9 }
  0x2a   :  { %617 = vmatpush.xpose.msk.msra.mxu2 %vm63_vm0, %v48_v10  ;;  %585 = vmatpush.xpose.msk.msra.mxu0 %vm63_vm0, %v48_v10  ;;  %v439_v10 = vld [vmem:[%s1040_s5 + $0x28] sm:$0xff] }
  0x2c   :  { %335 = vperm.xlu0 %640, %v269_v51   ;;  %v249_v51 = vld [vmem:[%s1041_s3 + $0x40] sm:$0xff] }
  0x2d   :  { %340 = vperm.xlu1 %641, %v270_v53   ;;  %v250_v53 = vld [vmem:[%s1041_s3 + $0x48] sm:$0xff] }
  0x2e   :  { %618 = vmatpush.xpose.msk.msra.mxu2 %vm63_vm0, %v47_v11  ;;  %586 = vmatpush.xpose.msk.msra.mxu0 %vm63_vm0, %v47_v11 }
  0x32   :  { %619 = vmatpush.xpose.msk.msra.mxu2 %vm63_vm0, %v46_v12  ;;  %587 = vmatpush.xpose.msk.msra.mxu0 %vm63_vm0, %v46_v12  ;;  %v440_v12 = vld [vmem:[%s1040_s5 + $0x30] sm:$0xff] }
  0x34   :  { %350 = vperm.xlu0 %640, %v272_v56   ;;  %v244_v56 = vld [vmem:[%s1041_s3 + $0x18] sm:$0xff] }
  0x35   :  { %452 = vperm.xlu1 %641, %v434_v60   ;;  %v246_v60 = vld [vmem:[%s1041_s3 + $0x28] sm:$0xff] }
  0x36   :  { %620 = vmatpush.xpose.msk.msra.mxu2 %vm63_vm0, %v45_v13  ;;  %588 = vmatpush.xpose.msk.msra.mxu0 %vm63_vm0, %v45_v13 }
  0x3a   :  { %621 = vmatpush.xpose.msk.msra.mxu2 %vm63_vm0, %v44_v14  ;;  %589 = vmatpush.xpose.msk.msra.mxu0 %vm63_vm0, %v44_v14 }
  0x3c   :  { %462 = vperm.xlu0 %640, %v436_v3  }
  0x3d   :  { %467 = vperm.xlu1 %641, %v437_v4  }
  0x3e   :  { %622 = vmatpush.xpose.msk.msra.mxu2 %vm63_vm0, %v43_v15  ;;  %590 = vmatpush.xpose.msk.msra.mxu0 %vm63_vm0, %v43_v15  ;;  %v268_v15 = vld [vmem:[%s1039_s4 + $0x58] sm:$0xff] }
  0x3f   :  { %330 = vperm.xlu2 %642, %v268_v15  }
  0x41   :  { %599 = vmatmul.msk.f32.vlgmr.msra.gmra.mxu2 %vm63_vm0, %v35_v16  ;;  %591 = vmatmul.msk.f32.vlgmr.msra.gmra.mxu0 %vm63_vm0, %v27_v17 }
  0x44   :  { %477 = vperm.xlu0 %640, %v439_v10  }
  0x45   :  { %482 = vperm.xlu1 %641, %v440_v12  }
  0x49   :  { %600 = vmatmul.msk.f32.gmra.mxu2 %vm63_vm0, %v36_v18  ;;  %592 = vmatmul.msk.f32.gmra.mxu0 %vm63_vm0, %v28_v19  ;;  %v442_v18 = vld [vmem:[%s1040_s5 + $0x40] sm:$0xff]  ;;  %v443_v19 = vld [vmem:[%s1040_s5 + $0x48] sm:$0xff] }
  0x4c   :  { %492 = vperm.xlu0 %640, %v442_v18  }
  0x4d   :  { %497 = vperm.xlu1 %641, %v443_v19  }
  0x51   :  { %601 = vmatmul.msk.f32.gmra.mxu2 %vm63_vm0, %v37_v20  ;;  %593 = vmatmul.msk.f32.gmra.mxu0 %vm63_vm0, %v29_v21 }
  0x59   :  { %602 = vmatmul.msk.f32.gmra.mxu2 %vm63_vm0, %v38_v22  ;;  %594 = vmatmul.msk.f32.gmra.mxu0 %vm63_vm0, %v30_v23 }
  0x61   :  { %603 = vmatmul.msk.f32.gmra.mxu2 %vm63_vm0, %v39_v24  ;;  %595 = vmatmul.msk.f32.gmra.mxu0 %vm63_vm0, %v31_v25  ;;  %v271_v24 = vld [vmem:[%s1039_s4 + $0x70] sm:$0xff] }
  0x62   :  { %345 = vperm.xlu2 %642, %v271_v24  }
  0x69   :  { %604 = vmatmul.msk.f32.gmra.mxu2 %vm63_vm0, %v40_v26  ;;  %596 = vmatmul.msk.f32.gmra.mxu0 %vm63_vm0, %v32_v27  ;;  %v445_v26 = vld [vmem:[%s1040_s5 + $0x58] sm:$0xff] }
  0x6a   :  { %507 = vperm.xlu0 %640, %v445_v26   ;;  %v296_v4 = vpop.permute.xlu2 %295 }
  0x71   :  { %605 = vmatmul.msk.f32.gmra.mxu2 %vm63_vm0, %v41_v28  ;;  %597 = vmatmul.msk.f32.gmra.mxu0 %vm63_vm0, %v33_v29  ;;  %v446_v28 = vld [vmem:[%s1040_s5 + $0x60] sm:$0xff] }
  0x72   :  { %512 = vperm.xlu1 %641, %v446_v28   ;;  %v301_v7 = vpop.permute.xlu2 %300 }
  0x79   :  { %606 = vmatmul.msk.f32.gmra.mxu2 %vm63_vm0, %v42_v30  ;;  %598 = vmatmul.msk.f32.gmra.mxu0 %vm63_vm0, %v34_v31  ;;  %v435_v30 = vld [vmem:[%s1040_s5 + $0x8] sm:$0xff] }
  0x7a   :  { %457 = vperm.xlu2 %642, %v435_v30   ;;  %527 = vperm.xlu1 %641, %v449_v35  }
  0x7f   :  { %v286_v3 = vpop.permute.xlu1 %285 }
  0x82   :  { %472 = vperm.xlu2 %642, %v438_v38  }
  0xbe   :  { %v833_v34 = vpop.f32.mrf.mxu0 }
  0xc4   :  { %v829_v32 = vpop.f32.mrf.mxu2 }
  0xc5   :  { %v202_v21 = vadd.f32 %v884_v57, %v829_v32 }
  0xc6   :  { %v843_v39 = vpop.f32.mrf.mxu0 }
  0xc7   :  { %v233_v25 = vmax.f32 %v202_v21, 0.0  ;;  %v181_v46 = vadd.f32 %v884_v57, %v843_v39  ;;  %v241_v39 = vld [vmem:[%s1041_s3] sm:$0xff] }
  0xc9   :  { %v226_v49 = vmax.f32 %v181_v46, 0.0 }
  0xcc   :  { %v831_v33 = vpop.f32.mrf.mxu2 }
  0xcd   :  { %v205_v16 = vadd.f32 %v884_v57, %v831_v33  ;;  %v448_v33 = vld [vmem:[%s1040_s5 + $0x70] sm:$0xff] }
  0xce   :  { %v854_v45 = vpop.f32.mrf.mxu0  ;;  %522 = vperm.xlu0 %640, %v448_v33  }
  0xcf   :  { %v234_v22 = vmax.f32 %v205_v16, 0.0  ;;  %v184_v42 = vadd.f32 %v884_v57, %v854_v45  ;;  %v444_v45 = vld [vmem:[%s1040_s5 + $0x50] sm:$0xff] }
  0xd1   :  { %v227_v47 = vmax.f32 %v184_v42, 0.0 }
  0xd4   :  { %v835_v36 = vpop.f32.mrf.mxu2 }
  0xd5   :  { %v208_v13 = vadd.f32 %v884_v57, %v835_v36 }
  0xd6   :  { %v865_v50 = vpop.f32.mrf.mxu0 }
  0xd7   :  { %v235_v17 = vmax.f32 %v208_v13, 0.0 }
  0xdc   :  { %v210_v40 = vpop.f32.mrf.mxu2 }
  0xdd   :  { %v211_v8 = vadd.f32 %v884_v57, %v210_v40  ;;  %v187_v40 = vadd.f32 %v884_v57, %v865_v50 }
  0xde   :  { %v873_v54 = vpop.f32.mrf.mxu0 }
  0xdf   :  { %v236_v14 = vmax.f32 %v211_v8, 0.0  ;;  %v190_v36 = vadd.f32 %v884_v57, %v873_v54  ;;  %v228_v43 = vmax.f32 %v187_v40, 0.0  ;;  %v243_v54 = vld [vmem:[%s1041_s3 + $0x10] sm:$0xff] }
  0xe1   :  { %v229_v41 = vmax.f32 %v190_v36, 0.0 }
  0xe4   :  { %v213_v44 = vpop.f32.mrf.mxu2 }
  0xe5   :  { %v214_v5 = vadd.f32 %v884_v57, %v213_v44  ;;  %v441_v44 = vld [vmem:[%s1040_s5 + $0x38] sm:$0xff] }
  0xe6   :  { %v192_v0 = vpop.f32.mrf.mxu0  ;;  %487 = vperm.xlu2 %642, %v441_v44  }
  0xe7   :  { %v237_v9 = vmax.f32 %v214_v5, 0.0  ;;  %v193_v31 = vadd.f32 %v884_v57, %v192_v0  ;;  %v248_v0 = vld [vmem:[%s1041_s3 + $0x38] sm:$0xff] }
  0xe9   :  { %v230_v37 = vmax.f32 %v193_v31, 0.0 }
  0xec   :  { %v216_v48 = vpop.f32.mrf.mxu2 }
  0xed   :  { %v217_v1 = vadd.f32 %v884_v57, %v216_v48  ;;  %v178_v48 = vadd.f32 %v884_v57, %v833_v34  ;;  %v447_v34 = vld [vmem:[%s1040_s5 + $0x68] sm:$0xff] }
  0xee   :  { %v195_v11 = vpop.f32.mrf.mxu0  ;;  %502 = vperm.xlu2 %642, %v444_v45  }
  0xef   :  { %v238_v6 = vmax.f32 %v217_v1, 0.0  ;;  %v196_v29 = vadd.f32 %v884_v57, %v195_v11  ;;  %v225_v50 = vmax.f32 %v178_v48, 0.0  ;;  %v256_v1 = vld [vmem:[%s1041_s3 + $0x78] sm:$0xff]  ;;  %v316_v11 = vpop.permute.xlu2 %315 }
  0xf1   :  { %v231_v32 = vmax.f32 %v196_v29, 0.0 }
  0xf4   :  { %v219_v52 = vpop.f32.mrf.mxu2 }
  0xf5   :  { %v220_v61 = vadd.f32 %v884_v57, %v219_v52  ;;  %v242_v52 = vld [vmem:[%s1041_s3 + $0x8] sm:$0xff] }
  0xf6   :  { %v198_v20 = vpop.f32.mrf.mxu0  ;;  %517 = vperm.xlu2 %642, %v447_v34  }
  0xf7   :  { %v239_v2 = vmax.f32 %v220_v61, 0.0  ;;  %v199_v23 = vadd.f32 %v884_v57, %v198_v20  ;;  %v254_v61 = vld [vmem:[%s1041_s3 + $0x68] sm:$0xff]  ;;  %v331_v16 = vpop.permute.xlu2 %330 }
  0xf9   :  { %v232_v27 = vmax.f32 %v199_v23, 0.0 }
  0xfc   :  { %v222_v58 = vpop.f32.mrf.mxu2 }
  0xfd   :  { %v223_v59 = vadd.f32 %v884_v57, %v222_v58  ;;  %v252_v57 = vld [vmem:[%s1041_s3 + $0x58] sm:$0xff]  ;;  %v245_v58 = vld [vmem:[%s1041_s3 + $0x20] sm:$0xff] }
  0xff   :  { %v240_v62 = vmax.f32 %v223_v59, 0.0  ;;  %v253_v59 = vld [vmem:[%s1041_s3 + $0x60] sm:$0xff]  ;;  %v1022_v21 = vpop.permute.xlu2 %345 }
 0x101   :  { %353 = vmatpush.xpose.msra.mxu1 %v240_v62  ;;  %623 = vmatpush.xpose.msra.mxu3 %v240_v62  ;;  %v247_v62 = vld [vmem:[%s1041_s3 + $0x30] sm:$0xff] }
 0x105   :  { %354 = vmatpush.xpose.msra.mxu1 %v239_v2  ;;  %624 = vmatpush.xpose.msra.mxu3 %v239_v2  ;;  %v276_v2 = vpop.permute.xlu0 %275 }
 0x109   :  { %355 = vmatpush.xpose.msra.mxu1 %v238_v6  ;;  %625 = vmatpush.xpose.msra.mxu3 %v238_v6  ;;  %v291_v6 = vpop.permute.xlu1 %290 }
 0x10d   :  { %356 = vmatpush.xpose.msra.mxu1 %v237_v9  ;;  %626 = vmatpush.xpose.msra.mxu3 %v237_v9  ;;  %v281_v5 = vpop.permute.xlu0 %280 }
 0x111   :  { %357 = vmatpush.xpose.msra.mxu1 %v236_v14  ;;  %627 = vmatpush.xpose.msra.mxu3 %v236_v14  ;;  %v311_v9 = vpop.permute.xlu1 %310 }
 0x115   :  { %358 = vmatpush.xpose.msra.mxu1 %v235_v17  ;;  %628 = vmatpush.xpose.msra.mxu3 %v235_v17  ;;  %v306_v8 = vpop.permute.xlu0 %305 }
 0x119   :  { %359 = vmatpush.xpose.msra.mxu1 %v234_v22  ;;  %629 = vmatpush.xpose.msra.mxu3 %v234_v22  ;;  %v326_v13 = vpop.permute.xlu1 %325 }
 0x11d   :  { %360 = vmatpush.xpose.msra.mxu1 %v233_v25  ;;  %630 = vmatpush.xpose.msra.mxu3 %v233_v25  ;;  %v321_v12 = vpop.permute.xlu0 %320 }
 0x121   :  { %361 = vmatpush.xpose.msra.mxu1 %v232_v27  ;;  %631 = vmatpush.xpose.msra.mxu3 %v232_v27  ;;  %v1020_v19 = vpop.permute.xlu1 %340  ;;  %v458_v27 = vpop.permute.xlu2 %457 }
 0x125   :  { %362 = vmatpush.xpose.msra.mxu1 %v231_v32  ;;  %632 = vmatpush.xpose.msra.mxu3 %v231_v32  ;;  %v1018_v17 = vpop.permute.xlu0 %335 }
 0x129   :  { %363 = vmatpush.xpose.msra.mxu1 %v230_v37  ;;  %633 = vmatpush.xpose.msra.mxu3 %v230_v37  ;;  %v453_v25 = vpop.permute.xlu1 %452  ;;  %v473_v37 = vpop.permute.xlu2 %472 }
 0x12d   :  { %364 = vmatpush.xpose.msra.mxu1 %v229_v41  ;;  %634 = vmatpush.xpose.msra.mxu3 %v229_v41  ;;  %v1024_v23 = vpop.permute.xlu0 %350 }
 0x131   :  { %365 = vmatpush.xpose.msra.mxu1 %v228_v43  ;;  %635 = vmatpush.xpose.msra.mxu3 %v228_v43  ;;  %v468_v30 = vpop.permute.xlu1 %467 }
 0x135   :  { %366 = vmatpush.xpose.msra.mxu1 %v227_v47  ;;  %636 = vmatpush.xpose.msra.mxu3 %v227_v47  ;;  %v463_v29 = vpop.permute.xlu0 %462 }
 0x139   :  { %367 = vmatpush.xpose.msra.mxu1 %v226_v49  ;;  %637 = vmatpush.xpose.msra.mxu3 %v226_v49  ;;  %v483_v42 = vpop.permute.xlu1 %482 }
 0x13d   :  { %368 = vmatpush.xpose.msra.mxu1 %v225_v50  ;;  %638 = vmatpush.xpose.msra.mxu3 %v225_v50  ;;  %v478_v41 = vpop.permute.xlu0 %477 }
 0x140   :  { %369 = vmatmul.f32.vlgmr.msra.gmra.mxu1 %v241_v39  ;;  %393 = vmatmul.f32.vlgmr.msra.gmra.mxu3 %v249_v51 }
 0x148   :  { %372 = vmatmul.f32.gmra.mxu1 %v242_v52  ;;  %396 = vmatmul.f32.gmra.mxu3 %v250_v53 }
 0x150   :  { %375 = vmatmul.f32.gmra.mxu1 %v243_v54  ;;  %399 = vmatmul.f32.gmra.mxu3 %v251_v55 }
 0x158   :  { %378 = vmatmul.f32.gmra.mxu1 %v244_v56  ;;  %402 = vmatmul.f32.gmra.mxu3 %v252_v57  ;;  %v488_v56 = vpop.permute.xlu2 %487 }
 0x160   :  { %381 = vmatmul.f32.gmra.mxu1 %v245_v58  ;;  %405 = vmatmul.f32.gmra.mxu3 %v253_v59 }
 0x168   :  { %384 = vmatmul.f32.gmra.mxu1 %v246_v60  ;;  %408 = vmatmul.f32.gmra.mxu3 %v254_v61  ;;  %v493_v60 = vpop.permute.xlu0 %492  ;;  %v498_v61 = vpop.permute.xlu1 %497 }
 0x170   :  { %387 = vmatmul.f32.gmra.mxu1 %v247_v62  ;;  %411 = vmatmul.f32.gmra.mxu3 %v255_v63 }
 0x178   :  { %390 = vmatmul.f32.gmra.mxu1 %v248_v0  ;;  %414 = vmatmul.f32.gmra.mxu3 %v256_v1 }
 0x1bd   :  { %v370_v10 = vpop.f32.mrf.mxu1 }
 0x1be   :  { %v371_v35 = vadd.f32 %v370_v10, %v276_v2 }
 0x1c0   :  { %v418_v43 = vmax.f32 %v371_v35, 0.0  ;;  %v513_v35 = vpop.permute.xlu1 %512 }
 0x1c2   :  { %v530_v39 = vmul.f32 %v453_v25, %v418_v43 }
 0x1c3   :  { %v394_v14 = vpop.f32.mrf.mxu3 }
 0x1c4   :  { %v395_v62 = vadd.f32 %v394_v14, %v316_v11 }
 0x1c5   :  { %v373_v15 = vpop.f32.mrf.mxu1 }
 0x1c6   :  { %v374_v32 = vadd.f32 %v373_v15, %v281_v5 }
 0x1c8   :  { %v419_v38 = vmax.f32 %v374_v32, 0.0  ;;  %v508_v32 = vpop.permute.xlu0 %507 }
 0x1ca   :  { %v531_v48 = vmul.f32 %v458_v27, %v419_v38 }
 0x1cb   :  { %v397_v18 = vpop.f32.mrf.mxu3 }
 0x1cc   :  { %v546_v53 = vadd.f32 %v531_v48, %v530_v39 }
 0x1cd   :  { %v376_v20 = vpop.f32.mrf.mxu1 }
 0x1ce   :  { %v377_v36 = vadd.f32 %v376_v20, %v286_v3  ;;  %v398_v3 = vadd.f32 %v397_v18, %v321_v12 }
 0x1d0   :  { %v420_v44 = vmax.f32 %v377_v36, 0.0  ;;  %v427_v20 = vmax.f32 %v398_v3, 0.0 }
 0x1d2   :  { %v532_v51 = vmul.f32 %v463_v29, %v420_v44 }
 0x1d3   :  { %v400_v22 = vpop.f32.mrf.mxu3 }
 0x1d4   :  { %v547_v57 = vadd.f32 %v546_v53, %v532_v51 }
 0x1d5   :  { %v379_v24 = vpop.f32.mrf.mxu1 }
 0x1d6   :  { %v380_v40 = vadd.f32 %v379_v24, %v291_v6 }
 0x1d8   :  { %v421_v49 = vmax.f32 %v380_v40, 0.0 }
 0x1da   :  { %v533_v54 = vmul.f32 %v468_v30, %v421_v49 }
 0x1db   :  { %v403_v26 = vpop.f32.mrf.mxu3 }
 0x1dc   :  { %v548_v63 = vadd.f32 %v547_v57, %v533_v54  ;;  %v404_v24 = vadd.f32 %v403_v26, %v331_v16 }
 0x1dd   :  { %v382_v28 = vpop.f32.mrf.mxu1 }
 0x1de   :  { %v383_v46 = vadd.f32 %v382_v28, %v296_v4  ;;  %v503_v28 = vpop.permute.xlu2 %502  ;;  %v429_v12 = vmax.f32 %v404_v24, 0.0 }
 0x1e0   :  { %v422_v34 = vmax.f32 %v383_v46, 0.0 }
 0x1e2   :  { %v534_v58 = vmul.f32 %v473_v37, %v422_v34  ;;  %v541_v37 = vmul.f32 %v508_v32, %v429_v12 }
 0x1e3   :  { %v406_v31 = vpop.f32.mrf.mxu3 }
 0x1e4   :  { %v549_v4 = vadd.f32 %v548_v63, %v534_v58  ;;  %v407_v11 = vadd.f32 %v406_v31, %v1018_v17 }
 0x1e5   :  { %v385_v33 = vpop.f32.mrf.mxu1 }
 0x1e6   :  { %v386_v45 = vadd.f32 %v385_v33, %v301_v7  ;;  %v426_v7 = vmax.f32 %v395_v62, 0.0  ;;  %v539_v33 = vmul.f32 %v498_v61, %v427_v20  ;;  %v430_v36 = vmax.f32 %v407_v11, 0.0  ;;  %v518_v43 = vpop.permute.xlu2 %517 }
 0x1e8   :  { %v423_v55 = vmax.f32 %v386_v45, 0.0  ;;  %v538_v29 = vmul.f32 %v493_v60, %v426_v7  ;;  %v542_v17 = vmul.f32 %v513_v35, %v430_v36  ;;  %v528_v45 = vpop.permute.xlu1 %527 }
 0x1ea   :  { %v535_v0 = vmul.f32 %v478_v41, %v423_v55 }
 0x1eb   :  { %v409_v47 = vpop.f32.mrf.mxu3 }
 0x1ec   :  { %v550_v10 = vadd.f32 %v549_v4, %v535_v0  ;;  %v410_v18 = vadd.f32 %v409_v47, %v1020_v19  ;;  %v523_v47 = vpop.permute.xlu0 %522 }
 0x1ed   :  { %v388_v50 = vpop.f32.mrf.mxu1 }
 0x1ee   :  { %v389_v52 = vadd.f32 %v388_v50, %v306_v8  ;;  %v401_v8 = vadd.f32 %v400_v22, %v326_v13  ;;  %v431_v38 = vmax.f32 %v410_v18, 0.0 }
 0x1f0   :  { %v424_v59 = vmax.f32 %v389_v52, 0.0  ;;  %v428_v30 = vmax.f32 %v401_v8, 0.0  ;;  %v543_v44 = vmul.f32 %v518_v43, %v431_v38 }
 0x1f2   :  { %v536_v5 = vmul.f32 %v483_v42, %v424_v59  ;;  %v540_v22 = vmul.f32 %v503_v28, %v428_v30 }
 0x1f3   :  { %v412_v1 = vpop.f32.mrf.mxu3 }
 0x1f4   :  { %v551_v25 = vadd.f32 %v550_v10, %v536_v5  ;;  %v413_v16 = vadd.f32 %v412_v1, %v1022_v21 }
 0x1f5   :  { %v391_v2 = vpop.f32.mrf.mxu1 }
 0x1f6   :  { %v392_v6 = vadd.f32 %v391_v2, %v311_v9  ;;  %v432_v31 = vmax.f32 %v413_v16, 0.0 }
 0x1f8   :  { %v425_v15 = vmax.f32 %v392_v6, 0.0  ;;  %v544_v48 = vmul.f32 %v523_v47, %v432_v31 }
 0x1fa   :  { %v537_v27 = vmul.f32 %v488_v56, %v425_v15 }
 0x1fb   :  { %v415_v13 = vpop.f32.mrf.mxu3 }
 0x1fc   :  { %v552_v14 = vadd.f32 %v551_v25, %v537_v27  ;;  %v416_v41 = vadd.f32 %v415_v13, %v1024_v23  ;;  %v568_v23 = vstv %s1042_s6 }
 0x1fe   :  { %v553_v9 = vadd.f32 %v552_v14, %v538_v29  ;;  %v433_v46 = vmax.f32 %v416_v41, 0.0 }
 0x200   :  { %v554_v26 = vadd.f32 %v553_v9, %v539_v33  ;;  %v545_v50 = vmul.f32 %v528_v45, %v433_v46 }
 0x202   :  { %v555_v40 = vadd.f32 %v554_v26, %v540_v22 }
 0x204   :  { %v556_v42 = vadd.f32 %v555_v40, %v541_v37 }
 0x206   :  { %v557_v19 = vadd.f32 %v556_v42, %v542_v17 }
 0x208   :  { %v558_v49 = vadd.f32 %v557_v19, %v543_v44 }
 0x20a   :  { %v559_v39 = vadd.f32 %v558_v49, %v544_v48 }
 0x20c   :  { %v560_v21 = vadd.f32 %v559_v39, %v545_v50 }
 0x20e   :  { %v561_v51 = vrot.slane %v560_v21, 4 }
 0x210   :  { %v562_v34 = vadd.f32 %v561_v51, %v560_v21 }
 0x212   :  { %v563_v52 = vrot.slane %v562_v34, 2 }
 0x214   :  { %v564_v53 = vadd.f32 %v563_v52, %v562_v34 }
 0x216   :  { %v565_v54 = vrot.slane %v564_v53, 1 }
 0x218   :  { %v566_v55 = vadd.f32 %v565_v54, %v564_v53 }
 0x21a   :  { %v569_v56 = vadd.f32 %v568_v23, %v566_v55 }
 0x21c   :  { %570 = vst [vmem:[%s1043_s7] sm:$0x1] %v569_v56 }

</bundles_post_ra>
